<compile_context>
chip_gen: v7x
topology: tpu7x:2x2x1
jax: 0.10.0
libtpu: 0.0.40
codegen_flags: <defaults>
</compile_context>

<pallas_src>
import itertools

import numpy as np
import jax
import jax.numpy as jnp
from jax.experimental import pallas as pl
from jax.experimental.pallas import tpu as pltpu

LOG_2PI = float(np.log(2.0 * np.pi))

# bf16 matmul operands (f32 accumulate) per the perf review; set to jnp.float32
# to reproduce the reference f32 numerics exactly (modulo MXU rounding).
MATMUL_DTYPE = jnp.bfloat16

# Per-step row-tile byte budget (inputs + outputs, single-buffered).  With the
# pipeline's double buffering this stays well under the scoped-VMEM default of
# every chip (v5e 16 MiB, v6e/v7x 32 MiB scoped, v7x 64 MiB physical), so no
# vmem_limit_bytes override is needed.
_ROW_TILE_BUDGET_BYTES = 4 << 20


def _pick_block_rows(n, bytes_per_row):
    """VMEM-budget-derived row-tile size (review: no 'bn = n' trap at large N)."""
    cap = max(128, _ROW_TILE_BUDGET_BYTES // max(bytes_per_row, 1))
    if n <= cap:
        return n                          # single tile: block == full array
    num_tiles = -(-n // cap)
    bn = -(-n // num_tiles)               # balanced tiles
    return -(-bn // 128) * 128            # multiple of 128 (v5e MXU geometry)


# --------------------------------------------------------------------------
# The single fused kernel
# --------------------------------------------------------------------------
def _make_ant_kernel(n_enc_layers, n_dec_layers):
    def _mm(a, w):
        # Activations cast at the dot boundary; f32 accumulation on the MXU.
        return jnp.dot(a.astype(w.dtype), w, preferred_element_type=jnp.float32)

    def kernel(x_ref, env_ref, noise_ref, valid_ref, sel_ref, *refs):
        enc_out, recon_out, gmm_out, sse_out, cm_out, gmm_lhs = refs[-6:]
        it = iter(refs[:-6])
        nxt = lambda: next(it)[...]

        bn = x_ref.shape[0]
        latent = noise_ref.shape[1]
        n_k = cm_out.shape[1]

        x = x_ref[...]
        env = env_ref[...]

        # ----- encoder: split first-layer dot (no concat(x, env) tensor) -----
        w1x, w1e, b1 = nxt(), nxt(), nxt()
        h = jnp.maximum(_mm(x, w1x) + _mm(env, w1e) + b1, 0.0)
        for _ in range(n_enc_layers - 1):
            w, b = nxt(), nxt()
            h = jnp.maximum(_mm(h, w) + b, 0.0)

        # packed mu|log_var head: one (H, 2L) contraction, sliced in-vreg.
        w_head, b_head = nxt(), nxt()
        head = _mm(h, w_head) + b_head
        mu = head[:, :latent]
        lv = head[:, latent:]
        z = mu + noise_ref[...] * jnp.exp(0.5 * lv)

        # ----- decoder on mu_z (as in ANT.forward), split first-layer dot ----
        dw1z, dw1e, db1 = nxt(), nxt(), nxt()
        g = _mm(mu, dw1z) + _mm(env, dw1e) + db1
        if n_dec_layers == 1:
            recon = jax.nn.sigmoid(g)
        else:
            g = jnp.maximum(g, 0.0)
            for li in range(1, n_dec_layers):
                w, b = nxt(), nxt()
                g = _mm(g, w) + b
                g = jax.nn.sigmoid(g) if li == n_dec_layers - 1 else jnp.maximum(g, 0.0)
            recon = g

        # ----- GMM statistics: ONE deep (2bn, 2L)x(2L, K) MXU contraction ----
        # replaces the previous five (bn, L)x(L, K) contractions.
        gmm_rhs, c_sum = nxt(), nxt()
        # clamp before exp: the exp(ls2_z) * exp(-ls2_c) split can overflow f32
        # where the reference exp(ls2_z - ls2_c) would not.
        exp_lv = jnp.exp(jnp.minimum(lv, 80.0))
        gmm_lhs[:bn, :latent] = z * z
        gmm_lhs[:bn, latent:] = z
        gmm_lhs[bn:, :latent] = exp_lv + mu * mu
        gmm_lhs[bn:, latent:] = mu
        quad = jnp.dot(gmm_lhs[...], gmm_rhs, preferred_element_type=jnp.float32)
        log_prob = -0.5 * (latent * LOG_2PI + c_sum + quad[:bn])   # log N(z|c)
        kl_inner = c_sum + quad[bn:]                               # per-row KL term

        # ----- lane-dense per-row output slabs (one HBM stream each) ---------
        enc_out[:, :latent] = mu
        enc_out[:, latent:2 * latent] = lv
        enc_out[:, 2 * latent:] = z
        recon_out[...] = recon
        gmm_out[:, :n_k] = log_prob
        gmm_out[:, n_k:] = kl_inner

        # ----- cross-tile accumulators (resident output blocks) --------------
        @pl.when(pl.program_id(0) == 0)
        def _init():
            sse_out[...] = jnp.zeros(sse_out.shape, sse_out.dtype)
            cm_out[...] = jnp.zeros(cm_out.shape, cm_out.dtype)

        valid = valid_ref[...]                 # 1.0 real row / 0.0 padded row
        d = recon - x
        sse_out[...] += jnp.sum(valid * d * d, axis=(0, 1), keepdims=True)
        cm_out[...] += jnp.dot(sel_ref[...], log_prob,
                               preferred_element_type=jnp.float32)

    return kernel


def _ant_fused_call(params, x, env, noise, valid, sel, bn):
    n_pad, f = x.shape
    e = env.shape[1]
    latent = noise.shape[1]
    n_k = params["mu_c"].shape[0]
    n_cls = sel.shape[0]
    wd = MATMUL_DTYPE

    enc_mlp = params["enc_mlp"]
    dec_mlp = params["dec_mlp"]

    # encoder weights: first layer split (x / env) -> no concat input tensor.
    w1, b1 = enc_mlp[0]
    weights = [w1[:f].astype(wd), w1[f:].astype(wd), b1]
    for w, b in enc_mlp[1:]:
        weights += [w.astype(wd), b]
    # packed mu|log_var head.
    w_head = jnp.concatenate([params["enc_mu"][0], params["enc_logvar"][0]], axis=1)
    b_head = jnp.concatenate([params["enc_mu"][1], params["enc_logvar"][1]], axis=1)
    weights += [w_head.astype(wd), b_head]
    # decoder weights: first layer split (z / env).
    dw1, db1 = dec_mlp[0]
    weights += [dw1[:latent].astype(wd), dw1[latent:].astype(wd), db1]
    for w, b in dec_mlp[1:]:
        weights += [w.astype(wd), b]
    # GMM cluster constants hoisted out of the hot path (param-only, tiny):
    #   gmm_rhs = [1/sigma_c^2 ; -2 mu_c/sigma_c^2] stacked to (2L, K)
    #   c_sum   = sum_d log sigma_c^2 + sum_d mu_c^2/sigma_c^2         (1, K)
    mu_c = params["mu_c"]
    ls2_c = params["log_sigma2_c"]
    inv_c = jnp.exp(-ls2_c)
    gmm_rhs = jnp.concatenate([inv_c.T, -2.0 * (mu_c * inv_c).T], axis=0)
    c_sum = (jnp.sum(ls2_c, axis=1) + jnp.sum(mu_c * mu_c * inv_c, axis=1))[None, :]
    weights += [gmm_rhs, c_sum]

    grid = (n_pad // bn,)

    def row_spec(cols):
        return pl.BlockSpec((bn, cols), lambda i: (i, 0))

    def const_spec(a):
        # TODO(synk): pipeline_mode=pl.Buffered(1) would stop these revisited
        # constant-index blocks from being double-buffered (VMEM saving);
        # omitted for compatibility with older Mosaic lowerings.
        return pl.BlockSpec(a.shape, lambda i: (0, 0))

    in_specs = [row_spec(f), row_spec(e), row_spec(latent), row_spec(1),
                pl.BlockSpec((n_cls, bn), lambda i: (0, i))]
    in_specs += [const_spec(w) for w in weights]

    out_shape = (jax.ShapeDtypeStruct((n_pad, 3 * latent), jnp.float32),
                 jax.ShapeDtypeStruct((n_pad, f), jnp.float32),
                 jax.ShapeDtypeStruct((n_pad, 2 * n_k), jnp.float32),
                 jax.ShapeDtypeStruct((1, 1), jnp.float32),
                 jax.ShapeDtypeStruct((n_cls, n_k), jnp.float32))
    out_specs = (row_spec(3 * latent), row_spec(f), row_spec(2 * n_k),
                 pl.BlockSpec((1, 1), lambda i: (0, 0)),
                 pl.BlockSpec((n_cls, n_k), lambda i: (0, 0)))

    return pl.pallas_call(
        _make_ant_kernel(len(enc_mlp), len(dec_mlp)),
        out_shape=out_shape,
        grid=grid,
        in_specs=in_specs,
        out_specs=out_specs,
        scratch_shapes=[pltpu.VMEM((2 * bn, 2 * latent), jnp.float32)],
        compiler_params=pltpu.CompilerParams(
            # cross-tile accumulators (SSE / class means) + resident output
            # blocks force a sequential row axis.
            dimension_semantics=("arbitrary",)),
    )(x, env, noise, valid, sel, *weights)


# --------------------------------------------------------------------------
# Tiny XLA epilogue: the eps / global-max dependent tail of the KLD.
# (global max over log_prob is a cross-row-tile dependency; everything here is
#  O(N*K) elementwise on tensors that are kernel outputs anyway.)
# --------------------------------------------------------------------------
@jax.jit
def _kld_epilogue(log_prob, kl_inner, ls2_z, env, meta_pi, temp, eps):
    max_lp = jnp.max(log_prob)                       # matches reference .max()
    prob = jnp.exp((log_prob - max_lp) / temp) + eps
    cluster_prob = prob / jnp.sum(prob, axis=1, keepdims=True)
    pi = jnp.dot(env, meta_pi)
    gamma = cluster_prob * pi
    gamma = gamma / jnp.sum(gamma, axis=1, keepdims=True)
    kl1 = 0.5 * jnp.sum(gamma * kl_inner)
    kl2 = jnp.sum(gamma * (jnp.log(pi) - jnp.log(gamma)))   # log split (review)
    kl3 = 0.5 * jnp.sum(1.0 + ls2_z)
    return kl1 - kl2 - kl3


# --------------------------------------------------------------------------
# Helpers
# --------------------------------------------------------------------------
def _build_sel(labels, idx_train, n, n_classes):
    """(C, N) class-mean selection matrix, built on device (review item)."""
    onehot = jax.nn.one_hot(labels, n_classes, dtype=jnp.float32).T        # (C, N)
    train_mask = jnp.zeros((n,), jnp.float32).at[idx_train].set(1.0)
    sel = onehot * train_mask[None, :]
    counts = jnp.maximum(jnp.sum(sel, axis=1, keepdims=True), 1.0)
    return sel / counts


def _linear_sum_assignment_bruteforce(cost):
    # TODO(synk): scipy.optimize.linear_sum_assignment has no Pallas/JAX
    # equivalent; brute force over permutations (fine for small cluster counts).
    cost = np.asarray(cost)
    n_rows, n_cols = cost.shape
    assert n_rows == n_cols, "brute-force assignment expects a square cost"
    best_sum, best_perm = None, None
    for perm in itertools.permutations(range(n_cols)):
        s = cost[np.arange(n_rows), list(perm)].sum()
        if best_sum is None or s < best_sum:
            best_sum, best_perm = s, perm
    return np.array(best_perm, dtype=np.int32)


def _maybe_squeeze1(x):
    return jnp.squeeze(x, axis=1) if x.shape[1] == 1 else x


# --------------------------------------------------------------------------
# Parameter init (deterministic, synthetic)
# --------------------------------------------------------------------------
def _init_linear(key, fan_in, fan_out):
    k1, k2 = jax.random.split(key)
    w = jax.random.normal(k1, (fan_in, fan_out), jnp.float32) / np.sqrt(fan_in)
    b = 0.01 * jax.random.normal(k2, (1, fan_out), jnp.float32)
    return w, b


def init_ant_params(key, enc_sizes, latent, dec_sizes, K, E):
    ks = iter(jax.random.split(key, 32))
    enc_dims = [enc_sizes[0] + E] + list(enc_sizes[1:])
    enc_mlp = [_init_linear(next(ks), a, b)
               for a, b in zip(enc_dims[:-1], enc_dims[1:])]
    enc_mu = _init_linear(next(ks), enc_dims[-1], latent)
    enc_logvar = _init_linear(next(ks), enc_dims[-1], latent)
    dec_dims = [latent + E] + list(dec_sizes)
    dec_mlp = [_init_linear(next(ks), a, b)
               for a, b in zip(dec_dims[:-1], dec_dims[1:])]
    mu_c = jax.random.normal(next(ks), (K, latent), jnp.float32)
    log_sigma2_c = 0.1 * jax.random.normal(next(ks), (K, latent), jnp.float32)
    learnable_meta_pi = jax.random.normal(next(ks), (E, K), jnp.float32)
    return dict(enc_mlp=enc_mlp, enc_mu=enc_mu, enc_logvar=enc_logvar,
                dec_mlp=dec_mlp, mu_c=mu_c, log_sigma2_c=log_sigma2_c,
                learnable_meta_pi=learnable_meta_pi)


# --------------------------------------------------------------------------
# ANT forward (mirrors ANT.forward)
# --------------------------------------------------------------------------
def ant_forward(params, x, environment, idx_train, labels, noise_key,
                n_classes=None, T=100.0, eps=1e-10):
    n, f = x.shape
    latent = params["mu_c"].shape[1]
    n_k = params["mu_c"].shape[0]
    e = environment.shape[1]
    if n_classes is None:
        # same tiny host sync the reference does via labels.max().item()
        n_classes = int(jax.device_get(jnp.max(labels))) + 1

    # VMEM-budget-derived row tiling (pad + mask the ragged last block).
    bytes_per_row = 4 * (2 * f + e + 4 * latent + 2 * n_k + n_classes + 1)
    bn = _pick_block_rows(n, bytes_per_row)
    num_tiles = -(-n // bn)
    n_pad = num_tiles * bn
    pad = n_pad - n

    noise = jax.random.normal(noise_key, (n, latent), jnp.float32)
    valid = jnp.ones((n, 1), jnp.float32)
    sel = _build_sel(labels, idx_train, n, n_classes)

    def padrows(a):
        return jnp.pad(a, ((0, pad), (0, 0))) if pad else a

    x_p, env_p, noise_p, valid_p = map(padrows, (x, environment, noise, valid))
    sel_p = jnp.pad(sel, ((0, 0), (0, pad))) if pad else sel

    # ---- ONE fused Pallas launch: encoder + reparam + decoder + SSE +
    #      GMM log-prob / kl-inner + per-class means.
    enc_slab, recon_pad, gmm_slab, sse, class_means = _ant_fused_call(
        params, x_p, env_p, noise_p, valid_p, sel_p, bn)

    mu_z = enc_slab[:n, :latent]
    ls2_z = enc_slab[:n, latent:2 * latent]
    z = enc_slab[:n, 2 * latent:]
    recon_x = recon_pad[:n]
    log_prob = gmm_slab[:n, :n_k]
    kl_inner = gmm_slab[:n, n_k:]

    # ---- KLD epilogue (dispatched before the host sync below).
    meta_pi = jax.nn.softmax(params["learnable_meta_pi"], axis=1)
    kl_loss = _kld_epilogue(log_prob, kl_inner, ls2_z, environment, meta_pi,
                            T, eps)

    # ---- host-side Hungarian matching on the tiny (C, K) matrix only; the
    # kernel and epilogue are already in flight, so this host work is hidden.
    c2c = np.asarray(jax.device_get(class_means))
    # Matches the reference torch.cat(per-class means).reshape(-1, n_classes):
    # identical flatten order (identity when latent_cluster == n_classes).
    c2c = c2c.reshape(-1, n_classes)
    match = _linear_sum_assignment_bruteforce(-c2c)   # match[class] -> cluster

    train_logp = log_prob[idx_train]                  # (n_train, K)
    matched = train_logp[:, jnp.asarray(match)]       # == train_logp.T[match].T
    train_labels = labels[idx_train]
    n_train = int(idx_train.shape[0])
    ali_loss = -jnp.mean(matched[jnp.arange(n_train), train_labels])

    recon_loss = sse[0, 0]

    return (recon_loss / n,
            kl_loss / n,
            ali_loss / n_train,
            recon_x,
            _maybe_squeeze1(mu_z),
            _maybe_squeeze1(ls2_z),
            z)


# --------------------------------------------------------------------------
if __name__ == "__main__":
    N, F, E = 16, 32, 3          # nodes, feature dim, #environments (conditional)
    LATENT, K = 8, 4             # latent size, latent clusters
    ENC_SIZES = [F, 32]          # encoder_layer_sizes
    DEC_SIZES = [32, F]          # decoder_layer_sizes (last = feature dim)
    TEMP = 100.0
    N_CLASSES = 4

    key = jax.random.PRNGKey(0)
    k_x, k_par, k_noise = jax.random.split(key, 3)

    x = jax.nn.sigmoid(jax.random.normal(k_x, (N, F), jnp.float32))
    environment = jax.nn.one_hot(jnp.arange(N) % E, E, dtype=jnp.float32)
    labels = jnp.arange(N) % N_CLASSES
    idx_train = jnp.arange(8)

    params = init_ant_params(k_par, ENC_SIZES, LATENT, DEC_SIZES, K, E)

    outs = ant_forward(params, x, environment, idx_train, labels, k_noise,
                       n_classes=N_CLASSES, T=TEMP)
    outs = jax.block_until_ready(outs)

    recon_loss, kl_loss, ali_loss, recon_x, mu_z, ls2_z, z = outs
    assert recon_x.shape == (N, F) and mu_z.shape == (N, LATENT)
    assert ls2_z.shape == (N, LATENT) and z.shape == (N, LATENT)
    assert all(bool(jnp.isfinite(v).all())
               for v in (recon_loss, kl_loss, ali_loss))
    print("KERNEL_OK")
</pallas_src>

<mosaic_0001>
module attributes {stable_mosaic.version = 11 : i64} {
  func.func @kernel(%arg0: i32, %arg1: memref<16x32xf32, #tpu.memory_space<vmem>>, %arg2: memref<16x3xf32, #tpu.memory_space<vmem>>, %arg3: memref<16x8xf32, #tpu.memory_space<vmem>>, %arg4: memref<16x1xf32, #tpu.memory_space<vmem>>, %arg5: memref<4x16xf32, #tpu.memory_space<vmem>>, %arg6: memref<32x32xbf16, #tpu.memory_space<vmem>>, %arg7: memref<3x32xbf16, #tpu.memory_space<vmem>>, %arg8: memref<1x32xf32, #tpu.memory_space<vmem>>, %arg9: memref<32x16xbf16, #tpu.memory_space<vmem>>, %arg10: memref<1x16xf32, #tpu.memory_space<vmem>>, %arg11: memref<8x32xbf16, #tpu.memory_space<vmem>>, %arg12: memref<3x32xbf16, #tpu.memory_space<vmem>>, %arg13: memref<1x32xf32, #tpu.memory_space<vmem>>, %arg14: memref<32x32xbf16, #tpu.memory_space<vmem>>, %arg15: memref<1x32xf32, #tpu.memory_space<vmem>>, %arg16: memref<16x4xf32, #tpu.memory_space<vmem>>, %arg17: memref<1x4xf32, #tpu.memory_space<vmem>>, %arg18: memref<16x24xf32, #tpu.memory_space<vmem>>, %arg19: memref<16x32xf32, #tpu.memory_space<vmem>>, %arg20: memref<16x8xf32, #tpu.memory_space<vmem>>, %arg21: memref<1x1xf32, #tpu.memory_space<vmem>>, %arg22: memref<4x4xf32, #tpu.memory_space<vmem>>, %arg23: memref<32x16xf32, #tpu.memory_space<vmem>>) attributes {dimension_semantics = [#tpu.dimension_semantics<arbitrary>], iteration_bounds = array<i64: 1>, scalar_prefetch = 0 : i64, scratch_operands = 1 : i64, tpu.core_type = #tpu.core_type<tc>, window_params = [{transform_indices = @transform_0, window_bounds = array<i64: 16, 32>}, {transform_indices = @transform_1, window_bounds = array<i64: 16, 3>}, {transform_indices = @transform_2, window_bounds = array<i64: 16, 8>}, {transform_indices = @transform_3, window_bounds = array<i64: 16, 1>}, {transform_indices = @transform_4, window_bounds = array<i64: 4, 16>}, {pipeline_mode = #tpu.pipeline_mode<synchronous>, transform_indices = @transform_5, window_bounds = array<i64: 32, 32>}, {pipeline_mode = #tpu.pipeline_mode<synchronous>, transform_indices = @transform_6, window_bounds = array<i64: 3, 32>}, {pipeline_mode = #tpu.pipeline_mode<synchronous>, transform_indices = @transform_7, window_bounds = array<i64: 1, 32>}, {pipeline_mode = #tpu.pipeline_mode<synchronous>, transform_indices = @transform_8, window_bounds = array<i64: 32, 16>}, {pipeline_mode = #tpu.pipeline_mode<synchronous>, transform_indices = @transform_9, window_bounds = array<i64: 1, 16>}, {pipeline_mode = #tpu.pipeline_mode<synchronous>, transform_indices = @transform_10, window_bounds = array<i64: 8, 32>}, {pipeline_mode = #tpu.pipeline_mode<synchronous>, transform_indices = @transform_11, window_bounds = array<i64: 3, 32>}, {pipeline_mode = #tpu.pipeline_mode<synchronous>, transform_indices = @transform_12, window_bounds = array<i64: 1, 32>}, {pipeline_mode = #tpu.pipeline_mode<synchronous>, transform_indices = @transform_13, window_bounds = array<i64: 32, 32>}, {pipeline_mode = #tpu.pipeline_mode<synchronous>, transform_indices = @transform_14, window_bounds = array<i64: 1, 32>}, {pipeline_mode = #tpu.pipeline_mode<synchronous>, transform_indices = @transform_15, window_bounds = array<i64: 16, 4>}, {pipeline_mode = #tpu.pipeline_mode<synchronous>, transform_indices = @transform_16, window_bounds = array<i64: 1, 4>}, {transform_indices = @transform_17, window_bounds = array<i64: 16, 24>}, {transform_indices = @transform_18, window_bounds = array<i64: 16, 32>}, {transform_indices = @transform_19, window_bounds = array<i64: 16, 8>}, {pipeline_mode = #tpu.pipeline_mode<synchronous>, transform_indices = @transform_20, window_bounds = array<i64: 1, 1>}, {pipeline_mode = #tpu.pipeline_mode<synchronous>, transform_indices = @transform_21, window_bounds = array<i64: 4, 4>}]} {
    %c0 = arith.constant 0 : index
    %c0_0 = arith.constant 0 : index
    %0 = vector.load %arg1[%c0, %c0_0] : memref<16x32xf32, #tpu.memory_space<vmem>>, vector<16x32xf32>
    %c0_1 = arith.constant 0 : index
    %c0_2 = arith.constant 0 : index
    %1 = vector.load %arg2[%c0_1, %c0_2] : memref<16x3xf32, #tpu.memory_space<vmem>>, vector<16x3xf32>
    %c0_3 = arith.constant 0 : index
    %c0_4 = arith.constant 0 : index
    %2 = vector.load %arg6[%c0_3, %c0_4] : memref<32x32xbf16, #tpu.memory_space<vmem>>, vector<32x32xbf16>
    %c0_5 = arith.constant 0 : index
    %c0_6 = arith.constant 0 : index
    %3 = vector.load %arg7[%c0_5, %c0_6] : memref<3x32xbf16, #tpu.memory_space<vmem>>, vector<3x32xbf16>
    %c0_7 = arith.constant 0 : index
    %c0_8 = arith.constant 0 : index
    %4 = vector.load %arg8[%c0_7, %c0_8] : memref<1x32xf32, #tpu.memory_space<vmem>>, vector<1x32xf32>
    %5 = arith.truncf %0 : vector<16x32xf32> to vector<16x32xbf16>
    %cst = arith.constant dense<0.000000e+00> : vector<16x32xf32>
    %6 = tpu.matmul %5, %2, %cst {dimension_numbers = #tpu.dot_dimension_numbers<[1], [0], [0], [1], [0, 0, 1, 1], [], []>} : vector<16x32xbf16>, vector<32x32xbf16>, vector<16x32xf32> -> vector<16x32xf32>
    %7 = arith.truncf %1 : vector<16x3xf32> to vector<16x3xbf16>
    %cst_9 = arith.constant dense<0.000000e+00> : vector<16x32xf32>
    %8 = tpu.matmul %7, %3, %cst_9 {dimension_numbers = #tpu.dot_dimension_numbers<[1], [0], [0], [1], [0, 0, 1, 1], [], []>} : vector<16x3xbf16>, vector<3x32xbf16>, vector<16x32xf32> -> vector<16x32xf32>
    %9 = arith.addf %6, %8 : vector<16x32xf32>
    %10 = vector.broadcast %4 : vector<1x32xf32> to vector<16x32xf32>
    %11 = arith.addf %9, %10 : vector<16x32xf32>
    %cst_10 = arith.constant 0.000000e+00 : f32
    %12 = vector.broadcast %cst_10 : f32 to vector<16x32xf32>
    %13 = arith.maximumf %11, %12 : vector<16x32xf32>
    %c0_11 = arith.constant 0 : index
    %c0_12 = arith.constant 0 : index
    %14 = vector.load %arg9[%c0_11, %c0_12] : memref<32x16xbf16, #tpu.memory_space<vmem>>, vector<32x16xbf16>
    %c0_13 = arith.constant 0 : index
    %c0_14 = arith.constant 0 : index
    %15 = vector.load %arg10[%c0_13, %c0_14] : memref<1x16xf32, #tpu.memory_space<vmem>>, vector<1x16xf32>
    %16 = arith.truncf %13 : vector<16x32xf32> to vector<16x32xbf16>
    %cst_15 = arith.constant dense<0.000000e+00> : vector<16x16xf32>
    %17 = tpu.matmul %16, %14, %cst_15 {dimension_numbers = #tpu.dot_dimension_numbers<[1], [0], [0], [1], [0, 0, 1, 1], [], []>} : vector<16x32xbf16>, vector<32x16xbf16>, vector<16x16xf32> -> vector<16x16xf32>
    %18 = vector.broadcast %15 : vector<1x16xf32> to vector<16x16xf32>
    %19 = arith.addf %17, %18 : vector<16x16xf32>
    %20 = vector.extract_strided_slice %19 {offsets = [0, 0], sizes = [16, 8], strides = [1, 1]} : vector<16x16xf32> to vector<16x8xf32>
    %21 = vector.extract_strided_slice %19 {offsets = [0, 8], sizes = [16, 8], strides = [1, 1]} : vector<16x16xf32> to vector<16x8xf32>
    %c0_16 = arith.constant 0 : index
    %c0_17 = arith.constant 0 : index
    %22 = vector.load %arg3[%c0_16, %c0_17] : memref<16x8xf32, #tpu.memory_space<vmem>>, vector<16x8xf32>
    %cst_18 = arith.constant 5.000000e-01 : f32
    %23 = vector.broadcast %cst_18 : f32 to vector<16x8xf32>
    %24 = arith.mulf %23, %21 : vector<16x8xf32>
    %25 = math.exp %24 : vector<16x8xf32>
    %26 = arith.mulf %22, %25 : vector<16x8xf32>
    %27 = arith.addf %20, %26 : vector<16x8xf32>
    %c0_19 = arith.constant 0 : index
    %c0_20 = arith.constant 0 : index
    %28 = vector.load %arg11[%c0_19, %c0_20] : memref<8x32xbf16, #tpu.memory_space<vmem>>, vector<8x32xbf16>
    %c0_21 = arith.constant 0 : index
    %c0_22 = arith.constant 0 : index
    %29 = vector.load %arg12[%c0_21, %c0_22] : memref<3x32xbf16, #tpu.memory_space<vmem>>, vector<3x32xbf16>
    %c0_23 = arith.constant 0 : index
    %c0_24 = arith.constant 0 : index
    %30 = vector.load %arg13[%c0_23, %c0_24] : memref<1x32xf32, #tpu.memory_space<vmem>>, vector<1x32xf32>
    %31 = arith.truncf %20 : vector<16x8xf32> to vector<16x8xbf16>
    %cst_25 = arith.constant dense<0.000000e+00> : vector<16x32xf32>
    %32 = tpu.matmul %31, %28, %cst_25 {dimension_numbers = #tpu.dot_dimension_numbers<[1], [0], [0], [1], [0, 0, 1, 1], [], []>} : vector<16x8xbf16>, vector<8x32xbf16>, vector<16x32xf32> -> vector<16x32xf32>
    %33 = arith.truncf %1 : vector<16x3xf32> to vector<16x3xbf16>
    %cst_26 = arith.constant dense<0.000000e+00> : vector<16x32xf32>
    %34 = tpu.matmul %33, %29, %cst_26 {dimension_numbers = #tpu.dot_dimension_numbers<[1], [0], [0], [1], [0, 0, 1, 1], [], []>} : vector<16x3xbf16>, vector<3x32xbf16>, vector<16x32xf32> -> vector<16x32xf32>
    %35 = arith.addf %32, %34 : vector<16x32xf32>
    %36 = vector.broadcast %30 : vector<1x32xf32> to vector<16x32xf32>
    %37 = arith.addf %35, %36 : vector<16x32xf32>
    %cst_27 = arith.constant 0.000000e+00 : f32
    %38 = vector.broadcast %cst_27 : f32 to vector<16x32xf32>
    %39 = arith.maximumf %37, %38 : vector<16x32xf32>
    %c0_28 = arith.constant 0 : index
    %c0_29 = arith.constant 0 : index
    %40 = vector.load %arg14[%c0_28, %c0_29] : memref<32x32xbf16, #tpu.memory_space<vmem>>, vector<32x32xbf16>
    %c0_30 = arith.constant 0 : index
    %c0_31 = arith.constant 0 : index
    %41 = vector.load %arg15[%c0_30, %c0_31] : memref<1x32xf32, #tpu.memory_space<vmem>>, vector<1x32xf32>
    %42 = arith.truncf %39 : vector<16x32xf32> to vector<16x32xbf16>
    %cst_32 = arith.constant dense<0.000000e+00> : vector<16x32xf32>
    %43 = tpu.matmul %42, %40, %cst_32 {dimension_numbers = #tpu.dot_dimension_numbers<[1], [0], [0], [1], [0, 0, 1, 1], [], []>} : vector<16x32xbf16>, vector<32x32xbf16>, vector<16x32xf32> -> vector<16x32xf32>
    %44 = vector.broadcast %41 : vector<1x32xf32> to vector<16x32xf32>
    %45 = arith.addf %43, %44 : vector<16x32xf32>
    %46 = arith.negf %45 : vector<16x32xf32>
    %47 = math.exp %46 : vector<16x32xf32>
    %cst_33 = arith.constant 1.000000e+00 : f32
    %48 = vector.broadcast %cst_33 : f32 to vector<16x32xf32>
    %49 = arith.addf %48, %47 : vector<16x32xf32>
    %50 = arith.divf %48, %49 : vector<16x32xf32>
    %c0_34 = arith.constant 0 : index
    %c0_35 = arith.constant 0 : index
    %51 = vector.load %arg16[%c0_34, %c0_35] : memref<16x4xf32, #tpu.memory_space<vmem>>, vector<16x4xf32>
    %c0_36 = arith.constant 0 : index
    %c0_37 = arith.constant 0 : index
    %52 = vector.load %arg17[%c0_36, %c0_37] : memref<1x4xf32, #tpu.memory_space<vmem>>, vector<1x4xf32>
    %cst_38 = arith.constant 8.000000e+01 : f32
    %53 = vector.broadcast %cst_38 : f32 to vector<16x8xf32>
    %54 = arith.minimumf %21, %53 : vector<16x8xf32>
    %55 = math.exp %54 : vector<16x8xf32>
    %56 = arith.mulf %27, %27 : vector<16x8xf32>
    %c0_39 = arith.constant 0 : index
    %c0_40 = arith.constant 0 : index
    %57 = vector.load %arg23[%c0_39, %c0_40] : memref<32x16xf32, #tpu.memory_space<vmem>>, vector<16x8xf32>
    tpu.vector_store %arg23[%c0_39, %c0_40], %56 {strides = array<i32>} : memref<32x16xf32, #tpu.memory_space<vmem>>, vector<16x8xf32>,
    %c0_41 = arith.constant 0 : index
    %c8 = arith.constant 8 : index
    %58 = vector.load %arg23[%c0_41, %c8] : memref<32x16xf32, #tpu.memory_space<vmem>>, vector<16x8xf32>
    tpu.vector_store %arg23[%c0_41, %c8], %27 {strides = array<i32>} : memref<32x16xf32, #tpu.memory_space<vmem>>, vector<16x8xf32>,
    %59 = arith.mulf %20, %20 : vector<16x8xf32>
    %60 = arith.addf %55, %59 : vector<16x8xf32>
    %c16 = arith.constant 16 : index
    %c0_42 = arith.constant 0 : index
    %61 = vector.load %arg23[%c16, %c0_42] : memref<32x16xf32, #tpu.memory_space<vmem>>, vector<16x8xf32>
    tpu.vector_store %arg23[%c16, %c0_42], %60 {strides = array<i32>} : memref<32x16xf32, #tpu.memory_space<vmem>>, vector<16x8xf32>,
    %c16_43 = arith.constant 16 : index
    %c8_44 = arith.constant 8 : index
    %62 = vector.load %arg23[%c16_43, %c8_44] : memref<32x16xf32, #tpu.memory_space<vmem>>, vector<16x8xf32>
    tpu.vector_store %arg23[%c16_43, %c8_44], %20 {strides = array<i32>} : memref<32x16xf32, #tpu.memory_space<vmem>>, vector<16x8xf32>,
    %c0_45 = arith.constant 0 : index
    %c0_46 = arith.constant 0 : index
    %63 = vector.load %arg23[%c0_45, %c0_46] : memref<32x16xf32, #tpu.memory_space<vmem>>, vector<32x16xf32>
    %cst_47 = arith.constant dense<0.000000e+00> : vector<32x4xf32>
    %64 = tpu.matmul %63, %51, %cst_47 {dimension_numbers = #tpu.dot_dimension_numbers<[1], [0], [0], [1], [0, 0, 1, 1], [], []>} : vector<32x16xf32>, vector<16x4xf32>, vector<32x4xf32> -> vector<32x4xf32>
    %cst_48 = arith.constant 14.7030163 : f32
    %65 = vector.broadcast %cst_48 : f32 to vector<1x4xf32>
    %66 = arith.addf %65, %52 : vector<1x4xf32>
    %67 = vector.extract_strided_slice %64 {offsets = [0, 0], sizes = [16, 4], strides = [1, 1]} : vector<32x4xf32> to vector<16x4xf32>
    %68 = vector.broadcast %66 : vector<1x4xf32> to vector<16x4xf32>
    %69 = arith.addf %68, %67 : vector<16x4xf32>
    %cst_49 = arith.constant -5.000000e-01 : f32
    %70 = vector.broadcast %cst_49 : f32 to vector<16x4xf32>
    %71 = arith.mulf %70, %69 : vector<16x4xf32>
    %72 = vector.extract_strided_slice %64 {offsets = [16, 0], sizes = [16, 4], strides = [1, 1]} : vector<32x4xf32> to vector<16x4xf32>
    %73 = vector.broadcast %52 : vector<1x4xf32> to vector<16x4xf32>
    %74 = arith.addf %73, %72 : vector<16x4xf32>
    %c0_50 = arith.constant 0 : index
    %c0_51 = arith.constant 0 : index
    %75 = vector.load %arg18[%c0_50, %c0_51] : memref<16x24xf32, #tpu.memory_space<vmem>>, vector<16x8xf32>
    tpu.vector_store %arg18[%c0_50, %c0_51], %20 {strides = array<i32>} : memref<16x24xf32, #tpu.memory_space<vmem>>, vector<16x8xf32>,
    %c0_52 = arith.constant 0 : index
    %c8_53 = arith.constant 8 : index
    %76 = vector.load %arg18[%c0_52, %c8_53] : memref<16x24xf32, #tpu.memory_space<vmem>>, vector<16x8xf32>
    tpu.vector_store %arg18[%c0_52, %c8_53], %21 {strides = array<i32>} : memref<16x24xf32, #tpu.memory_space<vmem>>, vector<16x8xf32>,
    %c0_54 = arith.constant 0 : index
    %c16_55 = arith.constant 16 : index
    %77 = vector.load %arg18[%c0_54, %c16_55] : memref<16x24xf32, #tpu.memory_space<vmem>>, vector<16x8xf32>
    tpu.vector_store %arg18[%c0_54, %c16_55], %27 {strides = array<i32>} : memref<16x24xf32, #tpu.memory_space<vmem>>, vector<16x8xf32>,
    %c0_56 = arith.constant 0 : index
    %c0_57 = arith.constant 0 : index
    %78 = vector.load %arg19[%c0_56, %c0_57] : memref<16x32xf32, #tpu.memory_space<vmem>>, vector<16x32xf32>
    tpu.vector_store %arg19[%c0_56, %c0_57], %50 {strides = array<i32>} : memref<16x32xf32, #tpu.memory_space<vmem>>, vector<16x32xf32>,
    %c0_58 = arith.constant 0 : index
    %c0_59 = arith.constant 0 : index
    %79 = vector.load %arg20[%c0_58, %c0_59] : memref<16x8xf32, #tpu.memory_space<vmem>>, vector<16x4xf32>
    tpu.vector_store %arg20[%c0_58, %c0_59], %71 {strides = array<i32>} : memref<16x8xf32, #tpu.memory_space<vmem>>, vector<16x4xf32>,
    %c0_60 = arith.constant 0 : index
    %c4 = arith.constant 4 : index
    %80 = vector.load %arg20[%c0_60, %c4] : memref<16x8xf32, #tpu.memory_space<vmem>>, vector<16x4xf32>
    tpu.vector_store %arg20[%c0_60, %c4], %74 {strides = array<i32>} : memref<16x8xf32, #tpu.memory_space<vmem>>, vector<16x4xf32>,
    %c0_i32 = arith.constant 0 : i32
    %81 = arith.cmpi eq, %arg0, %c0_i32 : i32
    %82 = arith.extui %81 : i1 to i32
    %c0_i32_61 = arith.constant 0 : i32
    %83 = arith.cmpi ne, %82, %c0_i32_61 : i32
    scf.if %83 {
      %cst_76 = arith.constant 0.000000e+00 : f32
      %102 = vector.broadcast %cst_76 : f32 to vector<1x1xf32>
      %c0_77 = arith.constant 0 : index
      %c0_78 = arith.constant 0 : index
      %103 = vector.load %arg21[%c0_77, %c0_78] : memref<1x1xf32, #tpu.memory_space<vmem>>, vector<1x1xf32>
      tpu.vector_store %arg21[%c0_77, %c0_78], %102 {strides = array<i32>} : memref<1x1xf32, #tpu.memory_space<vmem>>, vector<1x1xf32>,
      %cst_79 = arith.constant 0.000000e+00 : f32
      %104 = vector.broadcast %cst_79 : f32 to vector<4x4xf32>
      %c0_80 = arith.constant 0 : index
      %c0_81 = arith.constant 0 : index
      %105 = vector.load %arg22[%c0_80, %c0_81] : memref<4x4xf32, #tpu.memory_space<vmem>>, vector<4x4xf32>
      tpu.vector_store %arg22[%c0_80, %c0_81], %104 {strides = array<i32>} : memref<4x4xf32, #tpu.memory_space<vmem>>, vector<4x4xf32>,
    } else {
    }
    %c0_62 = arith.constant 0 : index
    %c0_63 = arith.constant 0 : index
    %84 = vector.load %arg4[%c0_62, %c0_63] : memref<16x1xf32, #tpu.memory_space<vmem>>, vector<16x1xf32>
    %85 = arith.subf %50, %0 : vector<16x32xf32>
    %c0_64 = arith.constant 0 : index
    %c0_65 = arith.constant 0 : index
    %86 = vector.load %arg21[%c0_64, %c0_65] : memref<1x1xf32, #tpu.memory_space<vmem>>, vector<1x1xf32>
    %87 = vector.broadcast %84 : vector<16x1xf32> to vector<16x32xf32>
    %88 = arith.mulf %87, %85 : vector<16x32xf32>
    %89 = arith.mulf %88, %85 : vector<16x32xf32>
    %90 = vector.shape_cast %89 : vector<16x32xf32> to vector<1x16x32xf32>
    %cst_66 = arith.constant dense<0.000000e+00> : vector<1xf32>
    %91 = vector.multi_reduction <add>, %90, %cst_66 [1, 2] : vector<1x16x32xf32> to vector<1xf32>
    %92 = vector.shape_cast %91 : vector<1xf32> to vector<1x1x1xf32>
    %93 = vector.extract %92[0, 0, 0] : f32 from vector<1x1x1xf32>
    %94 = vector.broadcast %93 : f32 to vector<1x1xf32>
    %95 = arith.addf %86, %94 : vector<1x1xf32>
    %c0_67 = arith.constant 0 : index
    %c0_68 = arith.constant 0 : index
    %96 = vector.load %arg21[%c0_67, %c0_68] : memref<1x1xf32, #tpu.memory_space<vmem>>, vector<1x1xf32>
    tpu.vector_store %arg21[%c0_67, %c0_68], %95 {strides = array<i32>} : memref<1x1xf32, #tpu.memory_space<vmem>>, vector<1x1xf32>,
    %c0_69 = arith.constant 0 : index
    %c0_70 = arith.constant 0 : index
    %97 = vector.load %arg22[%c0_69, %c0_70] : memref<4x4xf32, #tpu.memory_space<vmem>>, vector<4x4xf32>
    %c0_71 = arith.constant 0 : index
    %c0_72 = arith.constant 0 : index
    %98 = vector.load %arg5[%c0_71, %c0_72] : memref<4x16xf32, #tpu.memory_space<vmem>>, vector<4x16xf32>
    %cst_73 = arith.constant dense<0.000000e+00> : vector<4x4xf32>
    %99 = tpu.matmul %98, %71, %cst_73 {dimension_numbers = #tpu.dot_dimension_numbers<[1], [0], [0], [1], [0, 0, 1, 1], [], []>} : vector<4x16xf32>, vector<16x4xf32>, vector<4x4xf32> -> vector<4x4xf32>
    %100 = arith.addf %97, %99 : vector<4x4xf32>
    %c0_74 = arith.constant 0 : index
    %c0_75 = arith.constant 0 : index
    %101 = vector.load %arg22[%c0_74, %c0_75] : memref<4x4xf32, #tpu.memory_space<vmem>>, vector<4x4xf32>
    tpu.vector_store %arg22[%c0_74, %c0_75], %100 {strides = array<i32>} : memref<4x4xf32, #tpu.memory_space<vmem>>, vector<4x4xf32>,
    return
  }
  func.func @transform_0(%arg0: i32) -> (i32, i32) {
    %c0_i32 = arith.constant 0 : i32
    %c0_i32_0 = arith.constant 0 : i32
    return %arg0, %c0_i32 : i32, i32
  }
  func.func @transform_1(%arg0: i32) -> (i32, i32) {
    %c0_i32 = arith.constant 0 : i32
    %c0_i32_0 = arith.constant 0 : i32
    return %arg0, %c0_i32 : i32, i32
  }
  func.func @transform_2(%arg0: i32) -> (i32, i32) {
    %c0_i32 = arith.constant 0 : i32
    %c0_i32_0 = arith.constant 0 : i32
    return %arg0, %c0_i32 : i32, i32
  }
  func.func @transform_3(%arg0: i32) -> (i32, i32) {
    %c0_i32 = arith.constant 0 : i32
    %c0_i32_0 = arith.constant 0 : i32
    return %arg0, %c0_i32 : i32, i32
  }
  func.func @transform_4(%arg0: i32) -> (i32, i32) {
    %c0_i32 = arith.constant 0 : i32
    %c0_i32_0 = arith.constant 0 : i32
    return %c0_i32, %arg0 : i32, i32
  }
  func.func @transform_5(%arg0: i32) -> (i32, i32) {
    %c0_i32 = arith.constant 0 : i32
    %c0_i32_0 = arith.constant 0 : i32
    %c0_i32_1 = arith.constant 0 : i32
    return %c0_i32, %c0_i32_0 : i32, i32
  }
  func.func @transform_6(%arg0: i32) -> (i32, i32) {
    %c0_i32 = arith.constant 0 : i32
    %c0_i32_0 = arith.constant 0 : i32
    %c0_i32_1 = arith.constant 0 : i32
    return %c0_i32, %c0_i32_0 : i32, i32
  }
  func.func @transform_7(%arg0: i32) -> (i32, i32) {
    %c0_i32 = arith.constant 0 : i32
    %c0_i32_0 = arith.constant 0 : i32
    %c0_i32_1 = arith.constant 0 : i32
    return %c0_i32, %c0_i32_0 : i32, i32
  }
  func.func @transform_8(%arg0: i32) -> (i32, i32) {
    %c0_i32 = arith.constant 0 : i32
    %c0_i32_0 = arith.constant 0 : i32
    %c0_i32_1 = arith.constant 0 : i32
    return %c0_i32, %c0_i32_0 : i32, i32
  }
  func.func @transform_9(%arg0: i32) -> (i32, i32) {
    %c0_i32 = arith.constant 0 : i32
    %c0_i32_0 = arith.constant 0 : i32
    %c0_i32_1 = arith.constant 0 : i32
    return %c0_i32, %c0_i32_0 : i32, i32
  }
  func.func @transform_10(%arg0: i32) -> (i32, i32) {
    %c0_i32 = arith.constant 0 : i32
    %c0_i32_0 = arith.constant 0 : i32
    %c0_i32_1 = arith.constant 0 : i32
    return %c0_i32, %c0_i32_0 : i32, i32
  }
  func.func @transform_11(%arg0: i32) -> (i32, i32) {
    %c0_i32 = arith.constant 0 : i32
    %c0_i32_0 = arith.constant 0 : i32
    %c0_i32_1 = arith.constant 0 : i32
    return %c0_i32, %c0_i32_0 : i32, i32
  }
  func.func @transform_12(%arg0: i32) -> (i32, i32) {
    %c0_i32 = arith.constant 0 : i32
    %c0_i32_0 = arith.constant 0 : i32
    %c0_i32_1 = arith.constant 0 : i32
    return %c0_i32, %c0_i32_0 : i32, i32
  }
  func.func @transform_13(%arg0: i32) -> (i32, i32) {
    %c0_i32 = arith.constant 0 : i32
    %c0_i32_0 = arith.constant 0 : i32
    %c0_i32_1 = arith.constant 0 : i32
    return %c0_i32, %c0_i32_0 : i32, i32
  }
  func.func @transform_14(%arg0: i32) -> (i32, i32) {
    %c0_i32 = arith.constant 0 : i32
    %c0_i32_0 = arith.constant 0 : i32
    %c0_i32_1 = arith.constant 0 : i32
    return %c0_i32, %c0_i32_0 : i32, i32
  }
  func.func @transform_15(%arg0: i32) -> (i32, i32) {
    %c0_i32 = arith.constant 0 : i32
    %c0_i32_0 = arith.constant 0 : i32
    %c0_i32_1 = arith.constant 0 : i32
    return %c0_i32, %c0_i32_0 : i32, i32
  }
  func.func @transform_16(%arg0: i32) -> (i32, i32) {
    %c0_i32 = arith.constant 0 : i32
    %c0_i32_0 = arith.constant 0 : i32
    %c0_i32_1 = arith.constant 0 : i32
    return %c0_i32, %c0_i32_0 : i32, i32
  }
  func.func @transform_17(%arg0: i32) -> (i32, i32) {
    %c0_i32 = arith.constant 0 : i32
    %c0_i32_0 = arith.constant 0 : i32
    return %arg0, %c0_i32 : i32, i32
  }
  func.func @transform_18(%arg0: i32) -> (i32, i32) {
    %c0_i32 = arith.constant 0 : i32
    %c0_i32_0 = arith.constant 0 : i32
    return %arg0, %c0_i32 : i32, i32
  }
  func.func @transform_19(%arg0: i32) -> (i32, i32) {
    %c0_i32 = arith.constant 0 : i32
    %c0_i32_0 = arith.constant 0 : i32
    return %arg0, %c0_i32 : i32, i32
  }
  func.func @transform_20(%arg0: i32) -> (i32, i32) {
    %c0_i32 = arith.constant 0 : i32
    %c0_i32_0 = arith.constant 0 : i32
    %c0_i32_1 = arith.constant 0 : i32
    return %c0_i32, %c0_i32_0 : i32, i32
  }
  func.func @transform_21(%arg0: i32) -> (i32, i32) {
    %c0_i32 = arith.constant 0 : i32
    %c0_i32_0 = arith.constant 0 : i32
    %c0_i32_1 = arith.constant 0 : i32
    return %c0_i32, %c0_i32_0 : i32, i32
  }
}

</mosaic_0001>

<bundles_post_ra>
// kernel: tpu_custom_call.1
= control target key start
LH: loop header
LB: loop body
LE: loop exit
PB: predicated region body
PF: predicated region fallthrough
CT: control target
= control target key end

     0   :  { %s1465_s0 = inlined_call_operand.vmem [shape: f32[16,32], index: 0, kind: input, shape index: {}]   ;;  %s1466_s1 = inlined_call_operand.vmem [shape: f32[16,3], index: 1, kind: input, shape index: {}]   ;;  %s1467_s2 = inlined_call_operand.vmem [shape: f32[16,8], index: 2, kind: input, shape index: {}]   ;;  %s1468_s3 = inlined_call_operand.vmem [shape: f32[16,1], index: 3, kind: input, shape index: {}]   ;;  %s1469_s4 = inlined_call_operand.vmem [shape: f32[4,16], index: 4, kind: input, shape index: {}]   ;;  %s1470_s5 = inlined_call_operand.vmem [shape: bf16[32,32], index: 5, kind: input, shape index: {}]   ;;  %s1471_s6 = inlined_call_operand.vmem [shape: bf16[3,32], index: 6, kind: input, shape index: {}]   ;;  %s1472_s7 = inlined_call_operand.vmem [shape: f32[1,32], index: 7, kind: input, shape index: {}]   ;;  %s1473_s8 = inlined_call_operand.vmem [shape: bf16[32,16], index: 8, kind: input, shape index: {}]   ;;  %s1474_s9 = inlined_call_operand.vmem [shape: f32[1,16], index: 9, kind: input, shape index: {}]   ;;  %s1475_s10 = inlined_call_operand.vmem [shape: bf16[8,32], index: 10, kind: input, shape index: {}]   ;;  %s1476_s11 = inlined_call_operand.vmem [shape: bf16[3,32], index: 11, kind: input, shape index: {}]   ;;  %s1477_s12 = inlined_call_operand.vmem [shape: f32[1,32], index: 12, kind: input, shape index: {}]   ;;  %s1478_s13 = inlined_call_operand.vmem [shape: bf16[32,32], index: 13, kind: input, shape index: {}]   ;;  %s1479_s14 = inlined_call_operand.vmem [shape: f32[1,32], index: 14, kind: input, shape index: {}]   ;;  %s1480_s15 = inlined_call_operand.vmem [shape: f32[16,4], index: 15, kind: input, shape index: {}]   ;;  %s1481_s16 = inlined_call_operand.vmem [shape: f32[1,4], index: 16, kind: input, shape index: {}]   ;;  %s1482_s17 = inlined_call_operand.hbm [shape: f32[16,24], index: 17, kind: output, shape index: {0}]   ;;  %s1483_s18 = inlined_call_operand.hbm [shape: f32[16,32], index: 18, kind: output, shape index: {1}]   ;;  %s1484_s19 = inlined_call_operand.vmem [shape: f32[16,8], index: 19, kind: output, shape index: {2}]   ;;  %s1485_s20 = inlined_call_operand.hbm [shape: f32[1,1], index: 20, kind: output, shape index: {3}]   ;;  %s1486_s21 = inlined_call_operand.hbm [shape: f32[4,4], index: 21, kind: output, shape index: {4}]  }
   0x1   :  { %1492 = sst [smem:[#allocation13_spill]] %s1465_s0 }
   0x2   :  { %1493 = sst [smem:[#allocation14_spill]] %s1466_s1 }
   0x3   :  { %1494 = sst [smem:[#allocation15_spill]] %s1467_s2 }
   0x4   :  { %1495 = sst [smem:[#allocation16_spill]] %s1468_s3 }
   0x5   :  { %1496 = sst [smem:[#allocation17_spill]] %s1469_s4 }
   0x6   :  { %1497 = sst [smem:[#allocation18_spill]] %s1470_s5 }
   0x7   :  { %27 = vsyncpa [#allocation4], 0 }
   0x8   :  { %28 = vsyncpa [#allocation6], 0  ;;  %s1498_s26 = sld [smem:[#allocation18_spill]]  ;;  %v1108_v1 = vmov 0.0   ;;  %v73_v2 = vld [vmem:[%s1471_s6] sm:$0x3] }
   0x9   :  { %914 = vmatprep.subr.bf16.mxu1 %v1108_v1  ;;  %908 = vmatprep.subr.bf16.mxu0 %v1108_v1  ;;  %vm81_vm0 = vcmask 1040384   ;;  %vm82_vm1 = vcmask 1041408   ;;  %v1109_v3 = vmov 65535   ;;  %v285_v5 = vld [vmem:[%s1476_s11] sm:$0x3]  ;;  %vm1110_vm2 = vmmov 0  }
   0xa   :  { %v83_v4 = vsel %vm81_vm0, 4294967295, %v1109_v3  ;;  %910 = vmatprep.mubr.msk.bf16.mxu0 %vm1110_vm2, %v1108_v1  ;;  %s1499_s5 = sld [smem:[#allocation14_spill]]  ;;  %918 = vmatprep.mubr.msk.bf16.mxu1 %vm1110_vm2, %v1108_v1  ;;  %vm77_vm3 = vcmask 23552   ;;  %s1500_s24 = sld [smem:[#allocation13_spill]]  ;;  %vm141_vm4 = vcmask 261120  }
   0xb   :  { %v84_v7 = vsel %vm82_vm1, %v83_v4, 0 }
   0xc   :  { %v86_v10 = vand.u32 %v84_v7, %v73_v2  ;;  %v289_v15 = vand.u32 %v285_v5, %v84_v7 }
   0xe   :  { %v992_v0 = vld [vmem:[%s1498_s26] sm:$0xff]   ;;  %v993_v6 = vld [vmem:[%s1498_s26 + $0x8] sm:$0xff]   ;;  %909 = vmatpush3.bf16.msra.mxu0 %v86_v10 }
   0xf   :  { %915 = vmatpush3.bf16.msra.mxu1 %v992_v0  ;;  %922 = vmatprep.subr.bf16.mxu0 %v1108_v1 }
  0x10   :  { %916 = vmatprep.subr.bf16.mxu1 %v1108_v1  ;;  %v67_v8 = vld [vmem:[%s1499_s5] sm:$0xff]  ;;  %v68_v9 = vld [vmem:[%s1499_s5 + $0x8] sm:$0xff] }
  0x11   :  { %v1260_v11 = vld [vmem:[%s1500_s24] sm:$0xff]  ;;  %v1265_v12 = vld [vmem:[%s1500_s24 + $0x8] sm:$0xff]  ;;  %v76_v13 = vpack.c.bf16 %v68_v9, %v67_v8 }
  0x12   :  { %v75_v14 = vpack.c.bf16 %v1265_v12, %v1260_v11 }
  0x13   :  { %917 = vmatpush3.bf16.msra.mxu1 %v993_v6 }
  0x14   :  { %930 = vmatprep.subr.bf16.mxu1 %v1108_v1 }
  0x15   :  { %29 = vsyncpa [#allocation9], 0  ;;  %911 = vmatmul.mubr.msk.bf16.vlgmr.msra.gmra.mrb[0].mxu0 %vm77_vm3, %v76_v13  ;;  %v994_v16 = vld [vmem:[%s1473_s8] sm:$0xff]   ;;  %v995_v17 = vld [vmem:[%s1473_s8 + $0x8] sm:$0xff]   ;;  %vm336_vm5 = vcmask 1043456   ;;  %vm332_vm6 = vcmask 64512  }
  0x16   :  { %919 = vmatmul.mubr.msk.bf16.vlgmr.msra.gmra.mrb[0].mxu1 %vm141_vm4, %v75_v14  ;;  %926 = vmatprep.mubr.msk.bf16.mxu0 %vm1110_vm2, %v1108_v1  ;;  %v865_v19 = vld [vmem:[%s1472_s7] ss:$0 sm:$0xff]  ;;  %vm492_vm7 = vcmask 130112   ;;  %v1112_v49 = vmov 0   ;;  %v997_v57 = vld [vmem:[%s1478_s13 + $0x8] sm:$0xff]   ;;  %s1501_s24 = sld [smem:[#allocation15_spill]] }
  0x17   :  { %931 = vmatpush3.bf16.msra.mxu1 %v289_v15  ;;  %932 = vmatprep.mubr.msk.bf16.mxu1 %vm1110_vm2, %v1108_v1  ;;  %v284_v34 = vld [vmem:[%s1475_s10] sm:$0xf]  ;;  %s1113_s10 = smov 8   ;;  %v472_v62 = vld [vmem:[%s1480_s15 + $0x8] sm:$0xff]  ;;  %s1502_s29 = sld [smem:[#allocation16_spill]]  ;;  %vm531_vm8 = vcmask 130048  }
  0x18   :  { %942 = vmatprep.subr.bf16.mxu1 %v1108_v1  ;;  %923 = vmatpush3.bf16.msra.mxu0 %v994_v16  ;;  %v338_v35 = vsel %vm336_vm5, %v284_v34, 0  ;;  %v866_v36 = vld [vmem:[%s1474_s9] ss:$0 sm:$0xff]  ;;  %s1111_s9 = smov 120   ;;  %s1114_s0 = smov 16   ;;  %vm658_vm9 = vcmask 195712  }
  0x19   :  { %924 = vmatprep.subr.bf16.mxu0 %v1108_v1  ;;  %990 = vset.pattern.permute.xlu0 %v1112_v49  ;;  %v996_v55 = vld [vmem:[%s1478_s13] sm:$0xff]   ;;  %vm663_vm10 = vcmask 31744   ;;  %vm681_vm11 = vcmask 0   ;;  %vm683_vm12 = vcmask 27648   ;;  %s1116_s2 = smov [#allocation5]  }
  0x1a   :  { %991 = vset.pattern.permute.xlu1 %v1112_v49  ;;  %v471_v61 = vld [vmem:[%s1480_s15] sm:$0xff]  ;;  %682 = vst.msk [vmem:[#allocation7] sm:$0x1] %vm681_vm11, %v1108_v1  ;;  %s815_s25 = sshll.u32 %s1116_s2, 4  ;;  %s816_s25 = int_to_ptr.vmem [resolvable:$true] %s815_s25 }
  0x1b   :  { %v967_v63 = vpack.c.bf16 %v472_v62, %v471_v61  ;;  %v873_v49 = vld [vmem:[%s1479_s14] ss:$0 sm:$0xff]  ;;  %v631_v62 = vlaneseq  ;;  %684 = vst.msk [vmem:[#allocation8] sm:$0xf] %vm683_vm12, %v1108_v1  ;;  %s1014_s26 = scalar_lea.vmem %s816_s25, 256  ;;  %p1019_p1 = scmp.lt.s32.totalorder %s816_s25, %s816_s25 }
  0x1c   :  { %925 = vmatpush3.bf16.msra.mxu0 %v995_v17  ;;  %v264_v60 = vld [vmem:[%s1501_s24] sm:$0xff]  ;;  %v265_v3 = vld [vmem:[%s1501_s24 + $0x8] sm:$0xff]  ;;  %s1503_s24 = sld [smem:[#allocation17_spill]]  ;;  %p1015_p0 = scmp.ne.s32.totalorder %s816_s25, %s1014_s26 }
  0x1d   :  { %936 = vmatprep.subr.bf16.mxu0 %v1108_v1  ;;  %v685_v16 = vld [vmem:[%s1502_s29] sm:$0xff]  ;;  %p1020_p2 = scmp.lt.s32.totalorder %s1014_s26, %s1014_s26 }
  0x1e   :  { %933 = vmatmul.mubr.msk.bf16.vlgmr.msra.gmra.mrb[4].mxu1 %vm77_vm3, %v76_v13  ;;  %v872_v17 = vld [vmem:[%s1477_s12] ss:$0 sm:$0xff] }
  0x1f   :  { %946 = vmatprep.mubr.msk.bf16.mxu1 %vm1110_vm2, %v1108_v1  ;;  %943 = vmatpush3.bf16.msra.mxu1 %v996_v55  ;;  %p1021_p3 = por %p1020_p2, %p1019_p1 }
  0x20   :  { %944 = vmatprep.subr.bf16.mxu1 %v1108_v1 }
  0x21   :  { %p1022_p4 = pnand %p1021_p3, %p1015_p0 }
  0x23   :  { %945 = vmatpush3.bf16.msra.mxu1 %v997_v57 }
  0xe8   :  { %v122_v18 = vpop.f32.mrb[0].mxu0 }
  0xe9   :  { %v179_v20 = vpop.f32.mrb[0].mxu1  ;;  %v912_v21 = vpop.f32.mrb[1].mxu0 }
  0xea   :  { %v180_v22 = vadd.f32 %v179_v20, %v122_v18  ;;  %v920_v23 = vpop.f32.mrb[1].mxu1  ;;  %v125_v24 = vpop.f32.mrb[2].mxu0 }
  0xeb   :  { %v182_v25 = vpop.f32.mrb[2].mxu1  ;;  %v913_v27 = vpop.f32.mrb[3].mxu0 }
  0xec   :  { %v192_v26 = vadd.f32 %v865_v19, %v180_v22  ;;  %v183_v28 = vadd.f32 %v182_v25, %v125_v24  ;;  %v921_v29 = vpop.f32.mrb[3].mxu1 }
  0xee   :  { %v193_v30 = vadd.f32 %v865_v19, %v183_v28  ;;  %v194_v31 = vmax.f32 %v192_v26, 0.0 }
  0xf0   :  { %v195_v32 = vmax.f32 %v193_v30, 0.0 }
  0xf1   :  { %v325_v52 = vpop.f32.mrb[4].mxu1 }
  0xf2   :  { %v201_v33 = vpack.c.bf16 %v195_v32, %v194_v31  ;;  %v934_v53 = vpop.f32.mrb[5].mxu1 }
  0xf3   :  { %v328_v54 = vpop.f32.mrb[6].mxu1 }
  0xf4   :  { %927 = vmatmul.mubr.msk.bf16.vlgmr.msra.gmra.mrb[4].mxu0 %vm141_vm4, %v201_v33  ;;  %v935_v56 = vpop.f32.mrb[7].mxu1 }
  0xf5   :  { %938 = vmatprep.mubr.msk.bf16.mxu0 %vm1110_vm2, %v1108_v1  ;;  %937 = vmatpush3.bf16.msra.mxu0 %v338_v35 }
  0xf6   :  { %968 = vmatprep.subr.bf16.mxu0 %v967_v63 }
 0x1c7   :  { %v257_v37 = vpop.f32.mrb[4].mxu0 }
 0x1c8   :  { %v1301_v38 = vadd.f32 %v866_v36, %v257_v37  ;;  %v928_v39 = vpop.f32.mrb[5].mxu0 }
 0x1c9   :  { %v260_v40 = vpop.f32.mrb[6].mxu0 }
 0x1ca   :  { %v1303_v41 = vadd.f32 %v866_v36, %v260_v40  ;;  %v929_v42 = vpop.f32.mrb[7].mxu0  ;;  %648 = vst.msk [vmem:[#allocation3] sm:$0xff] %vm332_vm6, %v1301_v38  ;;  %v266_v43 = vmul.f32 0.5, %v1301_v38  ;;  %v495_v51 = vmul.f32 %v1301_v38, %v1301_v38  ;;  %v474_v58 = vmin.f32 %v1301_v38, 80.0  ;;  %v686_v40 = vld [vmem:[%s1502_s29 + $0x8] sm:$0xff] }
 0x1cb   :  { %650 = vst.msk [vmem:[#allocation3] sm:$0xff] %vm492_vm7, %v1301_v38 }
 0x1cc   :  { %v287_v44 = vpack.c.bf16 %v1303_v41, %v1301_v38  ;;  %649 = vst.msk [vmem:[#allocation3 + $0x8] sm:$0xff] %vm332_vm6, %v1303_v41  ;;  %v268_v45 = vmul.f32 1.442695, %v266_v43  ;;  %v267_v46 = vmul.f32 0.5, %v1303_v41  ;;  %v476_v59 = vmul.f32 1.442695, %v474_v58 }
 0x1cd   :  { %651 = vst.msk [vmem:[#allocation3 + $0x8] sm:$0xff] %vm492_vm7, %v1303_v41  ;;  %v496_v15 = vmul.f32 %v1303_v41, %v1303_v41  ;;  %v475_v29 = vmin.f32 %v1303_v41, 80.0 }
 0x1ce   :  { %939 = vmatmul.mubr.msk.bf16.vlgmr.msra.gmra.mrb[8].mxu0 %vm332_vm6, %v287_v44  ;;  %998 = vpow2.f32 %v268_v45  ;;  %v270_v47 = vmul.f32 1.442695, %v267_v46  ;;  %v1115_v46 = vmov 0.0|0.0  }
 0x1cf   :  { %970 = vmatpush3.bf16.msra.mxu0 %v967_v63  ;;  %v478_v30 = vmul.f32 1.442695, %v475_v29  ;;  %971 = vmatprep.subr.bf16.mxu1 %v1115_v46  ;;  %v632_v63 = vshrl.u32 %v631_v62, 7 }
 0x1d0   :  { %1000 = vpow2.f32 %v270_v47 }
 0x1d1   :  { %1002 = vpow2.f32 %v476_v59 }
 0x1d2   :  { %1004 = vpow2.f32 %v478_v30 }
 0x1d8   :  { %v999_v48 = vpop.eup %998 }
 0x1d9   :  { %274 = vrot.lane.b32.xlu0 %v999_v48, %s1111_s9 }
 0x1da   :  { %v1001_v50 = vpop.eup %1000 }
 0x1db   :  { %v1003_v9 = vpop.eup %1002 }
 0x1dc   :  { %v1005_v34 = vpop.eup %1004 }
 0x1dd   :  { %276 = vrot.lane.b32.xlu0 %v1001_v50, %s1111_s9 }
 0x1e1   :  { %499 = vrot.lane.b32.xlu0 %v495_v51, %s1113_s10 }
 0x24b   :  { %v275_v0 = vpop.permute.xlu0 %274 }
 0x24c   :  { %v280_v2 = vmul.f32 %v275_v0, %v264_v60  ;;  %v473_v0 = vld [vmem:[%s1481_s16] sm:$0x1] }
 0x24e   :  { %v282_v4 = vadd.f32 %v280_v2, %v1301_v38 }
 0x24f   :  { %v277_v5 = vpop.permute.xlu0 %276 }
 0x250   :  { %v281_v6 = vmul.f32 %v277_v5, %v265_v3  ;;  %486 = vrot.lane.b32.xlu1 %v282_v4, %s1113_s10  ;;  %v480_v7 = vmul.f32 %v282_v4, %v282_v4  ;;  %v629_v3 = vadd.f32 14.703016, %v473_v0 }
 0x252   :  { %v283_v8 = vadd.f32 %v281_v6, %v1303_v41  ;;  %482 = vst.msk [vmem:[#allocation2] sm:$0xff] %vm332_vm6, %v480_v7 }
 0x253   :  { %v500_v10 = vpop.permute.xlu0 %499 }
 0x254   :  { %v505_v13 = vadd.f32 %v1003_v9, %v500_v10  ;;  %488 = vrot.lane.b32.xlu1 %v283_v8, %s1113_s10  ;;  %v481_v14 = vmul.f32 %v283_v8, %v283_v8 }
 0x256   :  { %509 = vrot.lane.b32.xlu0 %v505_v13, %s1111_s9  ;;  %483 = vst.msk [vmem:[#allocation2 + $0x8] sm:$0xff] %vm332_vm6, %v481_v14 }
 0x258   :  { %501 = vrot.lane.b32.xlu1 %v496_v15, %s1113_s10 }
 0x25a   :  { %519 = vrot.lane.b32.xlu0 %v1301_v38, %s1113_s10 }
 0x25e   :  { %692 = vperm.xlu0 %990, %v685_v16  }
 0x262   :  { %652 = vrot.lane.b32.xlu0 %v282_v4, %s1114_s0  ;;  %v633_v4 = vsub.s32 0, %v632_v63 }
 0x264   :  { %v634_v10 = vrot.slane %v629_v3, %v633_v4 }
 0x266   :  { %654 = vrot.lane.b32.xlu0 %v283_v8, %s1114_s0 }
 0x2a1   :  { %v374_v18 = vpop.f32.mrb[8].mxu0 }
 0x2a2   :  { %v375_v19 = vadd.f32 %v374_v18, %v325_v52  ;;  %v940_v20 = vpop.f32.mrb[9].mxu0 }
 0x2a3   :  { %v377_v21 = vpop.f32.mrb[10].mxu0 }
 0x2a4   :  { %v387_v22 = vadd.f32 %v872_v17, %v375_v19  ;;  %v378_v23 = vadd.f32 %v377_v21, %v328_v54  ;;  %v941_v24 = vpop.f32.mrb[11].mxu0 }
 0x2a5   :  { %v721_v24 = vld [vmem:[%s1503_s24] sm:$0xf] }
 0x2a6   :  { %v388_v25 = vadd.f32 %v872_v17, %v378_v23  ;;  %v389_v26 = vmax.f32 %v387_v22, 0.0 }
 0x2a8   :  { %v390_v27 = vmax.f32 %v388_v25, 0.0 }
 0x2aa   :  { %v396_v28 = vpack.c.bf16 %v390_v27, %v389_v26 }
 0x2ac   :  { %947 = vmatmul.mubr.msk.bf16.vlgmr.msra.gmra.mrb[8].mxu1 %vm141_vm4, %v396_v28 }
 0x2ad   :  { %964 = vmatprep.mubr.msk.f32.mxu1 %vm1110_vm2, %v1108_v1 }
 0x2c2   :  { %v487_v31 = vpop.permute.xlu1 %486 }
 0x2c3   :  { %493 = vst.msk [vmem:[#allocation2] sm:$0xff] %vm492_vm7, %v487_v31 }
 0x2c6   :  { %v489_v32 = vpop.permute.xlu1 %488 }
 0x2c7   :  { %494 = vst.msk [vmem:[#allocation2 + $0x8] sm:$0xff] %vm492_vm7, %v489_v32 }
 0x2c8   :  { %v510_v33 = vpop.permute.xlu0 %509 }
 0x2c9   :  { %515 = vst.msk [vmem:[#allocation2 + $0x10] sm:$0xff] %vm332_vm6, %v510_v33 }
 0x2ca   :  { %v502_v35 = vpop.permute.xlu1 %501  ;;  %v527_v36 = vld [vmem:[#allocation2] sm:$0xff] }
 0x2cb   :  { %v506_v37 = vadd.f32 %v1005_v34, %v502_v35  ;;  %954 = vmatprep.mubr.msk.f32.mxu0 %vm531_vm8, %v527_v36 }
 0x2cc   :  { %v520_v38 = vpop.permute.xlu0 %519 }
 0x2cd   :  { %525 = vst.msk [vmem:[#allocation2 + $0x10] sm:$0xff] %vm492_vm7, %v520_v38  ;;  %511 = vrot.lane.b32.xlu1 %v506_v37, %s1111_s9 }
 0x2ce   :  { %v528_v39 = vld [vmem:[#allocation2 + $0x8] sm:$0xff] }
 0x2cf   :  { %955 = vmatmul.mubr.msk.f32.vlgmr.msra.gmra.mrb[12].mxu0 %vm531_vm8, %v528_v39 }
 0x2d1   :  { %521 = vrot.lane.b32.xlu1 %v1303_v41, %s1113_s10 }
 0x2d4   :  { %v529_v42 = vld [vmem:[#allocation2 + $0x10] sm:$0xff] }
 0x2d5   :  { %957 = vmatprep.mubr.msk.f32.mxu0 %vm531_vm8, %v529_v42  ;;  %697 = vperm.xlu1 %991, %v686_v40  }
 0x2dd   :  { %v693_v43 = vpop.permute.xlu0 %692 }
 0x2e1   :  { %v653_v44 = vpop.permute.xlu0 %652 }
 0x2e2   :  { %659 = vst.msk [vmem:[#allocation3] sm:$0xff] %vm658_vm9, %v653_v44 }
 0x2e5   :  { %v655_v45 = vpop.permute.xlu0 %654 }
 0x2e6   :  { %660 = vst.msk [vmem:[#allocation3 + $0x8] sm:$0xff] %vm658_vm9, %v655_v45 }
 0x33f   :  { %v512_v47 = vpop.permute.xlu1 %511 }
 0x340   :  { %516 = vst.msk [vmem:[#allocation2 + $0x18] sm:$0xff] %vm332_vm6, %v512_v47 }
 0x343   :  { %v522_v41 = vpop.permute.xlu1 %521 }
 0x344   :  { %526 = vst.msk [vmem:[#allocation2 + $0x18] sm:$0xff] %vm492_vm7, %v522_v41 }
 0x34b   :  { %v530_v48 = vld [vmem:[#allocation2 + $0x18] sm:$0xff] }
 0x34c   :  { %958 = vmatmul.mubr.msk.f32.gmra.mrb[14].mxu0 %vm531_vm8, %v530_v48 }
 0x354   :  { %v698_v7 = vpop.permute.xlu1 %697 }
 0x37f   :  { %v452_v50 = vpop.f32.mrb[8].mxu1 }
 0x380   :  { %v453_v51 = vadd.f32 %v873_v49, %v452_v50  ;;  %v948_v52 = vpop.f32.mrb[9].mxu1 }
 0x381   :  { %v455_v53 = vpop.f32.mrb[10].mxu1 }
 0x382   :  { %v877_v54 = vmul.f32 -1.442695, %v453_v51  ;;  %v456_v55 = vadd.f32 %v873_v49, %v455_v53  ;;  %v949_v56 = vpop.f32.mrb[11].mxu1 }
 0x384   :  { %1006 = vpow2.f32 %v877_v54  ;;  %v878_v57 = vmul.f32 -1.442695, %v456_v55 }
 0x386   :  { %1008 = vpow2.f32 %v878_v57 }
 0x38e   :  { %v1007_v58 = vpop.eup %1006 }
 0x38f   :  { %v465_v59 = vadd.f32 1.0, %v1007_v58 }
 0x390   :  { %v1009_v60 = vpop.eup %1008 }
 0x391   :  { %1010 = vrcp.f32 %v465_v59  ;;  %v466_v61 = vadd.f32 1.0, %v1009_v60 }
 0x393   :  { %1012 = vrcp.f32 %v466_v61 }
 0x39b   :  { %v1011_v2 = vpop.eup %1010 }
 0x39c   :  { %661 = vst.msk [vmem:[#allocation5] sm:$0xff] %vm141_vm4, %v1011_v2  ;;  %v687_v5 = vsub.f32 %v1011_v2, %v1260_v11 }
 0x39d   :  { %v1013_v6 = vpop.eup %1012 }
 0x39e   :  { %662 = vst.msk [vmem:[#allocation5 + $0x8] sm:$0xff] %vm141_vm4, %v1013_v6  ;;  %v688_v8 = vsub.f32 %v1013_v6, %v1265_v12  ;;  %v700_v9 = vmul.f32 %v693_v43, %v687_v5 }
 0x3a0   :  { %v701_v13 = vmul.f32 %v698_v7, %v688_v8  ;;  %v702_v14 = vmul.f32 %v700_v9, %v687_v5 }
 0x3a2   :  { %v703_v15 = vmul.f32 %v701_v13, %v688_v8  ;;  %v956_v16 = vpop.f32.mrb[12].mxu0  ;;  %v704_v20 = vsel %vm141_vm4, %v702_v14, 0.0 }
 0x3a3   :  { %v637_v17 = vadd.f32 %v956_v16, %v634_v10  ;;  %v610_v18 = vpop.f32.mrb[13].mxu0 }
 0x3a4   :  { %v636_v19 = vadd.f32 %v634_v10, %v610_v18  ;;  %v705_v11 = vsel %vm141_vm4, %v703_v15, 0.0 }
 0x3a5   :  { %v639_v21 = vmul.f32 -0.5, %v637_v17  ;;  %v706_v22 = vadd.f32 %v705_v11, %v704_v20 }
 0x3a6   :  { %v638_v23 = vmul.f32 -0.5, %v636_v19 }
 0x3a7   :  { %665 = vst.msk [vmem:[%s1484_s19 + $0x8] sm:$0xff] %vm663_vm10, %v639_v21  ;;  %707 = vadd.xlane.f32.xlu1 %v706_v22 }
 0x3a8   :  { %664 = vst.msk [vmem:[%s1484_s19] sm:$0xff] %vm663_vm10, %v638_v23  ;;  %v972_v12 = vpack.c.bf16 %v639_v21, %v638_v23 }
 0x3aa   :  { %973 = vmatpush3.bf16.msra.mxu1 %v972_v12 }
 0x3ad   :  { %965 = vmatmul.mubr.msk.f32.vlgmr.msra.gmra.mrb[12].mxu1 %vm531_vm8, %v721_v24 }
 0x3ae   :  { %1025 = shalt.err (!%p1022_p4)
}
 0x3af   :  { %s1026_s3 = scalar_lea.hbm %s1483_s18, 256 }
 0x3b0   :  { %p1027_p5 = scmp.ne.s32.totalorder %s1483_s18, %s1026_s3  ;;  %p1030_p6 = scmp.lt.u32.totalorder %s1026_s3, %s1483_s18 }
 0x3b2   :  { %p1032_p7 = pnand %p1030_p6, %p1027_p5 }
 0x3b4   :  { %1035 = shalt.err (!%p1032_p7)
}
 0x3b5   :  { %s1117_s7 = smov 128   ;;  %s1118_s4 = smov [#allocation3]   ;;  %v644_v1 = vrot.slane %v473_v0, %v633_v4 }
 0x3b6   :  { %821 = dma.vmem_to_hbm [thread:$0]  %s816_s25, 256, %s1483_s18, [#allocation6], %s1117_s7, %s1117_s7, %s1113_s10  }
 0x3b7   :  { %s803_s6 = sshll.u32 %s1118_s4, 4  ;;  %s804_s6 = int_to_ptr.vmem [resolvable:$true] %s803_s6 }
 0x3b8   :  { %s1036_s9 = scalar_lea.vmem %s804_s6, 256  ;;  %p1041_p9 = scmp.lt.s32.totalorder %s804_s6, %s804_s6 }
 0x3b9   :  { %p1037_p8 = scmp.ne.s32.totalorder %s804_s6, %s1036_s9  ;;  %p1042_p10 = scmp.lt.s32.totalorder %s1036_s9, %s1036_s9 }
 0x3bb   :  { %p1043_p11 = por %p1042_p10, %p1041_p9 }
 0x3bd   :  { %p1044_p12 = pnand %p1043_p11, %p1037_p8 }
 0x3bf   :  { %1047 = shalt.err (!%p1044_p12)
}
 0x3c0   :  { %s1048_s16 = scalar_lea.hbm %s1482_s17, 256 }
 0x3c1   :  { %p1049_p13 = scmp.ne.s32.totalorder %s1482_s17, %s1048_s16  ;;  %p1052_p0 = scmp.lt.u32.totalorder %s1048_s16, %s1482_s17 }
 0x3c3   :  { %p1054_p1 = pnand %p1052_p0, %p1049_p13 }
 0x3c5   :  { %1057 = shalt.err (!%p1054_p1)
}
 0x3c6   :  { %809 = dma.vmem_to_hbm [thread:$0]  %s804_s6, 256, %s1482_s17, [#allocation4], %s1117_s7, %s1117_s7, %s1113_s10   ;;  %v689_v36 = vld [vmem:[#allocation7] sm:$0x1] }
 0x3c7   :  { %s1119_s24 = smov 4   ;;  %s1120_s2 = smov [#allocation7]  }
 0x3c8   :  { %s830_s25 = sshll.u32 %s1120_s2, 4  ;;  %s831_s25 = int_to_ptr.vmem [resolvable:$true] %s830_s25 }
 0x3c9   :  { %s1058_s17 = scalar_lea.vmem %s831_s25, 16  ;;  %s1062_s10 = scalar_lea.vmem %s831_s25, 32 }
 0x3ca   :  { %p1059_p2 = scmp.ne.s32.totalorder %s831_s25, %s1058_s17  ;;  %p1063_p3 = scmp.lt.s32.totalorder %s831_s25, %s831_s25 }
 0x3cb   :  { %p1064_p4 = scmp.lt.s32.totalorder %s1062_s10, %s1058_s17 }
 0x3cd   :  { %p1065_p5 = por %p1064_p4, %p1063_p3 }
 0x3cf   :  { %p1066_p6 = pnand %p1065_p5, %p1059_p2 }
 0x41f   :  { %v959_v25 = vpop.f32.mrb[14].mxu0 }
 0x420   :  { %v620_v26 = vpop.f32.mrb[15].mxu0  ;;  %v647_v28 = vadd.f32 %v959_v25, %v644_v1 }
 0x421   :  { %v646_v27 = vadd.f32 %v644_v1, %v620_v26 }
 0x423   :  { %668 = vrot.lane.b32.xlu0 %v646_v27, %s1119_s24 }
 0x427   :  { %670 = vrot.lane.b32.xlu0 %v647_v28, %s1119_s24 }
 0x434   :  { %v708_v29 = vpop.xlane.xlu1 %707 }
 0x435   :  { %v709_v30 = vrot.slane %v708_v29, 4 }
 0x437   :  { %v710_v31 = vadd.f32 %v709_v30, %v708_v29 }
 0x439   :  { %v711_v32 = vrot.slane %v710_v31, 2 }
 0x43b   :  { %v712_v33 = vadd.f32 %v711_v32, %v710_v31 }
 0x43d   :  { %v713_v34 = vrot.slane %v712_v33, 1 }
 0x43f   :  { %v714_v35 = vadd.f32 %v713_v34, %v712_v33 }
 0x441   :  { %974 = vpush %v714_v35 }
 0x472   :  { %s975_s26 = spop %974 }
 0x473   :  { %v716_v37 = vstv %s975_s26 }
 0x474   :  { %v717_v38 = vadd.f32 %v716_v37, %v689_v36 }
 0x476   :  { %719 = vst.msk [vmem:[#allocation7] sm:$0x1] %vm681_vm11, %v717_v38 }
 0x477   :  { %1069 = shalt.err (!%p1066_p6)
}
 0x478   :  { %s1070_s3 = scalar_lea.hbm %s1485_s20, 16 }
 0x479   :  { %p1071_p7 = scmp.ne.s32.totalorder %s1485_s20, %s1070_s3  ;;  %p1074_p8 = scmp.lt.u32.totalorder %s1070_s3, %s1485_s20 }
 0x47b   :  { %p1076_p9 = pnand %p1074_p8, %p1071_p7 }
 0x47d   :  { %1079 = shalt.err (!%p1076_p9)
}
 0x47e   :  { %833 = dma.vmem_to_hbm [thread:$0]  %s831_s25, 16, %s1485_s20, [#allocation6]   ;;  %v720_v39 = vld [vmem:[#allocation8] sm:$0xf] }
 0x47f   :  { %s1121_s12 = smov [#allocation8]  }
 0x480   :  { %s840_s4 = sshll.u32 %s1121_s12, 4  ;;  %v791_v40 = vpop.f32.mrb[12].mxu1  ;;  %s841_s4 = int_to_ptr.vmem [resolvable:$true] %s840_s4 }
 0x481   :  { %v795_v42 = vadd.f32 %v791_v40, %v720_v39  ;;  %v966_v43 = vpop.f32.mrb[13].mxu1  ;;  %s1080_s6 = scalar_lea.vmem %s841_s4, 64  ;;  %p1085_p11 = scmp.lt.s32.totalorder %s841_s4, %s841_s4 }
 0x482   :  { %p1081_p10 = scmp.ne.s32.totalorder %s841_s4, %s1080_s6  ;;  %p1086_p12 = scmp.lt.s32.totalorder %s1080_s6, %s1080_s6 }
 0x483   :  { %797 = vst.msk [vmem:[#allocation8] sm:$0xf] %vm683_vm12, %v795_v42 }
 0x484   :  { %p1087_p13 = por %p1086_p12, %p1085_p11 }
 0x486   :  { %p1088_p0 = pnand %p1087_p13, %p1081_p10 }
 0x488   :  { %1091 = shalt.err (!%p1088_p0)
}
 0x489   :  { %s1092_s20 = scalar_lea.hbm %s1486_s21, 64 }
 0x48a   :  { %p1093_p1 = scmp.ne.s32.totalorder %s1486_s21, %s1092_s20  ;;  %p1096_p2 = scmp.lt.u32.totalorder %s1092_s20, %s1486_s21 }
 0x48c   :  { %p1098_p3 = pnand %p1096_p2, %p1093_p1 }
 0x48e   :  { %1101 = shalt.err (!%p1098_p3)
}
 0x48f   :  { %843 = dma.vmem_to_hbm [thread:$0]  %s841_s4, 64, %s1486_s21, [#allocation9]   ;;  %vm674_vm13 = vcmask 64544  }
 0x495   :  { %v669_v44 = vpop.permute.xlu0 %668 }
 0x496   :  { %675 = vst.msk [vmem:[%s1484_s19] sm:$0xff] %vm674_vm13, %v669_v44 }
 0x499   :  { %v671_v45 = vpop.permute.xlu0 %670 }
 0x49a   :  { %676 = vst.msk [vmem:[%s1484_s19 + $0x8] sm:$0xff] %vm674_vm13, %v671_v45 }
 0x49b   :  { %1102 = dma.done.wait [#allocation4], 256  }
 0x49c   :  { %1103 = vsyncadd [#allocation4], 4294967040 }
 0x49d   :  { %1104 = dma.done.wait [#allocation6], 272  }
 0x49e   :  { %1105 = vsyncadd [#allocation6], 4294967024 }
 0x49f   :  { %1106 = dma.done.wait [#allocation9], 64  }
 0x4a0   :  { %1107 = vsyncadd [#allocation9], 4294967232 }
 0x4a1   :  { %858 = vsyncpa [#allocation4], 1 }
 0x4a2   :  { %859 = vsyncpa [#allocation6], 1 }
 0x4a3   :  { %860 = vsyncpa [#allocation9], 1 }

</bundles_post_ra>
